<compile_context>
chip_gen: v6e
topology: v6e:2x2x1
jax: 0.10.0
libtpu: 0.0.40
codegen_flags: <defaults>
</compile_context>

<pallas_src>
import jax
import jax.numpy as jnp
from jax.experimental import pallas as pl
from jax.experimental.pallas import tpu as pltpu


def _round_robin_kernel(
    emb_ref,              # [TM, E]        TM = sent_block * S token rows
    wc_ref, bc_ref,       # [E, H], [1, H]
    wt_ref, bt_ref,       # [H, H], [1, H]
    wtag_ref, btag_ref,   # [H, PT_PAD], [1, PT_PAD]  (fused pos|stag heads, lane-padded)
    wdu_ref,              # [H, A]         (= Wdep @ U, folded)
    wh_ref,               # [H, A]
    tag_ref,              # out: [TM, PT_PAD]          (pos|stag scores, lane-dense)
    head_ref,             # out: [sent_block, S, S]    (per-sentence arc scores)
):
    x = emb_ref[...]

    # shared contextualization (self.embed)
    h = jnp.tanh(
        jnp.dot(x, wc_ref[...], preferred_element_type=jnp.float32) + bc_ref[...]
    )

    # tag contextualization (self.tag_embed = embed -> tag_context)
    ht = jnp.tanh(
        jnp.dot(h, wt_ref[...], preferred_element_type=jnp.float32) + bt_ref[...]
    )

    # pos_tagger(sent) + super_tagger(sent): single fused lane-dense matmul
    tag_ref[...] = (
        jnp.dot(ht, wtag_ref[...], preferred_element_type=jnp.float32) + btag_ref[...]
    )

    # dep_parser(sent): biaffine arc scores over the *shared* context h
    bs, s, _ = head_ref.shape
    h_dep = jnp.dot(h, wdu_ref[...], preferred_element_type=jnp.float32)   # [TM, A]
    h_head = jnp.dot(h, wh_ref[...], preferred_element_type=jnp.float32)   # [TM, A]
    h_dep = h_dep.reshape(bs, s, -1)                                       # [bs, S, A]
    h_head = h_head.reshape(bs, s, -1)                                     # [bs, S, A]
    # contract on the trailing arc axis of both operands (no explicit transpose)
    head_ref[...] = jnp.einsum(
        "bqa,bka->bqk", h_dep, h_head, preferred_element_type=jnp.float32
    )                                                                      # [bs, S, S]


def fuse_params(params, *, lane_pad=128):
    """Fold U into Wdep and fuse the pos/stag heads into one lane-padded weight."""
    n_pos = params["wpos"].shape[1]
    n_stag = params["wstag"].shape[1]
    hidden = params["wpos"].shape[0]
    pt = n_pos + n_stag
    pt_pad = ((pt + lane_pad - 1) // lane_pad) * lane_pad

    wtag = jnp.zeros((hidden, pt_pad), jnp.float32)
    wtag = wtag.at[:, :n_pos].set(params["wpos"]).at[:, n_pos:pt].set(params["wstag"])
    btag = jnp.zeros((1, pt_pad), jnp.float32)
    btag = btag.at[:, :n_pos].set(params["bpos"]).at[:, n_pos:pt].set(params["bstag"])

    return {
        "wc": params["wc"], "bc": params["bc"],
        "wt": params["wt"], "bt": params["bt"],
        "wtag": wtag, "btag": btag,
        "wdu": params["wdep"] @ params["u"],   # (h@Wd)@U == h@(Wd@U)
        "wh": params["whead"],
        "pt_pad": pt_pad,
    }


def round_robin_forward(emb, fused, *, n_pos, n_stag, sent_block=16):
    """Fused RoundRobin forward over a batch of sentences. emb: [B, S, E] float32."""
    B, S, E = emb.shape
    assert B % sent_block == 0, "batch must be a multiple of sent_block"
    H = fused["wc"].shape[1]
    A = fused["wh"].shape[1]
    PT_PAD = fused["wtag"].shape[1]
    TM = sent_block * S                    # token rows per grid step (>=128)
    grid = (B // sent_block,)

    emb_flat = emb.reshape(B * S, E)

    def const_spec(shape):
        # constant block index -> weight DMA'd once, resident across the grid
        return pl.BlockSpec(shape, lambda b: (0, 0))

    in_specs = [
        pl.BlockSpec((TM, E), lambda b: (b, 0)),     # streaming token slab
        const_spec((E, H)), const_spec((1, H)),      # Wc, bc
        const_spec((H, H)), const_spec((1, H)),      # Wt, bt
        const_spec((H, PT_PAD)), const_spec((1, PT_PAD)),  # fused tag head
        const_spec((H, A)),                          # Wdu (= Wdep @ U)
        const_spec((H, A)),                          # Whead
    ]
    out_specs = (
        pl.BlockSpec((TM, PT_PAD), lambda b: (b, 0)),
        pl.BlockSpec((sent_block, S, S), lambda b: (b, 0, 0)),
    )
    out_shapes = (
        jax.ShapeDtypeStruct((B * S, PT_PAD), jnp.float32),   # fused pos|stag scores
        jax.ShapeDtypeStruct((B, S, S), jnp.float32),         # head (arc) scores
    )

    tag_flat, head = pl.pallas_call(
        _round_robin_kernel,
        out_shape=out_shapes,
        grid=grid,
        in_specs=in_specs,
        out_specs=out_specs,
        compiler_params=pltpu.CompilerParams(
            dimension_semantics=("parallel",),     # shards across TCs on v7x
        ),
    )(
        emb_flat,
        fused["wc"], fused["bc"],
        fused["wt"], fused["bt"],
        fused["wtag"], fused["btag"],
        fused["wdu"], fused["wh"],
    )

    pos = tag_flat[:, :n_pos].reshape(B, S, n_pos)
    stag = tag_flat[:, n_pos:n_pos + n_stag].reshape(B, S, n_stag)
    # Pred(pos=..., head=..., stag=...)
    return {"pos": pos, "head": head, "stag": stag}


def init_params(key, *, emb_dim, hidden, arc_dim, n_pos, n_stag):
    ks = jax.random.split(key, 9)
    scale = 0.1
    return {
        "wc": scale * jax.random.normal(ks[0], (emb_dim, hidden), jnp.float32),
        "bc": jnp.zeros((1, hidden), jnp.float32),
        "wt": scale * jax.random.normal(ks[1], (hidden, hidden), jnp.float32),
        "bt": jnp.zeros((1, hidden), jnp.float32),
        "wpos": scale * jax.random.normal(ks[2], (hidden, n_pos), jnp.float32),
        "bpos": jnp.zeros((1, n_pos), jnp.float32),
        "wstag": scale * jax.random.normal(ks[3], (hidden, n_stag), jnp.float32),
        "bstag": jnp.zeros((1, n_stag), jnp.float32),
        "wdep": scale * jax.random.normal(ks[4], (hidden, arc_dim), jnp.float32),
        "whead": scale * jax.random.normal(ks[5], (hidden, arc_dim), jnp.float32),
        "u": scale * jax.random.normal(ks[6], (arc_dim, arc_dim), jnp.float32),
    }


if __name__ == "__main__":
    # small shapes consistent with the module; batched so each grid step is 128 rows
    BATCH, SEQ, VOCAB, EMB, HIDDEN, ARC = 32, 8, 50, 32, 32, 32
    N_POS, N_STAG = 16, 32
    SENT_BLOCK = 16                      # 16 sentences * 8 tokens = 128 rows / step

    key = jax.random.PRNGKey(0)
    k_tok, k_tab, k_par = jax.random.split(key, 3)

    # sentences = token ids; embedding lookup is glue (outside the kernel)
    tokens = jax.random.randint(k_tok, (BATCH, SEQ), 0, VOCAB)
    emb_table = 0.1 * jax.random.normal(k_tab, (VOCAB, EMB), jnp.float32)
    x = emb_table[tokens]                                    # [B, S, E]

    params = init_params(k_par, emb_dim=EMB, hidden=HIDDEN, arc_dim=ARC,
                         n_pos=N_POS, n_stag=N_STAG)
    fused = fuse_params(params)

    pred = round_robin_forward(x, fused, n_pos=N_POS, n_stag=N_STAG,
                               sent_block=SENT_BLOCK)
    jax.block_until_ready(pred)

    # sanity: reference in plain JAX (unfused parameterization)
    h = jnp.tanh(x @ params["wc"] + params["bc"])
    ht = jnp.tanh(h @ params["wt"] + params["bt"])
    ref_pos = ht @ params["wpos"] + params["bpos"]
    ref_stag = ht @ params["wstag"] + params["bstag"]
    hd = (h @ params["wdep"]) @ params["u"]
    hh = h @ params["whead"]
    ref_head = jnp.einsum("bqa,bka->bqk", hd, hh)

    assert pred["pos"].shape == (BATCH, SEQ, N_POS)
    assert pred["stag"].shape == (BATCH, SEQ, N_STAG)
    assert pred["head"].shape == (BATCH, SEQ, SEQ)
    # U-folding changes fp associativity -> slightly loose tolerance
    assert jnp.allclose(pred["pos"], ref_pos, atol=1e-4)
    assert jnp.allclose(pred["stag"], ref_stag, atol=1e-4)
    assert jnp.allclose(pred["head"], ref_head, atol=1e-4)

    print("KERNEL_OK")
</pallas_src>

<mosaic_0001>
module attributes {stable_mosaic.version = 11 : i64} {
  func.func @_round_robin_kernel(%arg0: i32, %arg1: memref<128x32xf32, #tpu.memory_space<vmem>>, %arg2: memref<32x32xf32, #tpu.memory_space<vmem>>, %arg3: memref<1x32xf32, #tpu.memory_space<vmem>>, %arg4: memref<32x32xf32, #tpu.memory_space<vmem>>, %arg5: memref<1x32xf32, #tpu.memory_space<vmem>>, %arg6: memref<32x128xf32, #tpu.memory_space<vmem>>, %arg7: memref<1x128xf32, #tpu.memory_space<vmem>>, %arg8: memref<32x32xf32, #tpu.memory_space<vmem>>, %arg9: memref<32x32xf32, #tpu.memory_space<vmem>>, %arg10: memref<128x128xf32, #tpu.memory_space<vmem>>, %arg11: memref<16x8x8xf32, #tpu.memory_space<vmem>>) attributes {dimension_semantics = [#tpu.dimension_semantics<parallel>], iteration_bounds = array<i64: 2>, scalar_prefetch = 0 : i64, scratch_operands = 0 : i64, tpu.core_type = #tpu.core_type<tc>, window_params = [{transform_indices = @transform_0, window_bounds = array<i64: 128, 32>}, {pipeline_mode = #tpu.pipeline_mode<synchronous>, transform_indices = @transform_1, window_bounds = array<i64: 32, 32>}, {pipeline_mode = #tpu.pipeline_mode<synchronous>, transform_indices = @transform_2, window_bounds = array<i64: 1, 32>}, {pipeline_mode = #tpu.pipeline_mode<synchronous>, transform_indices = @transform_3, window_bounds = array<i64: 32, 32>}, {pipeline_mode = #tpu.pipeline_mode<synchronous>, transform_indices = @transform_4, window_bounds = array<i64: 1, 32>}, {pipeline_mode = #tpu.pipeline_mode<synchronous>, transform_indices = @transform_5, window_bounds = array<i64: 32, 128>}, {pipeline_mode = #tpu.pipeline_mode<synchronous>, transform_indices = @transform_6, window_bounds = array<i64: 1, 128>}, {pipeline_mode = #tpu.pipeline_mode<synchronous>, transform_indices = @transform_7, window_bounds = array<i64: 32, 32>}, {pipeline_mode = #tpu.pipeline_mode<synchronous>, transform_indices = @transform_8, window_bounds = array<i64: 32, 32>}, {transform_indices = @transform_9, window_bounds = array<i64: 128, 128>}, {transform_indices = @transform_10, window_bounds = array<i64: 16, 8, 8>}]} {
    %c0 = arith.constant 0 : index
    %c0_0 = arith.constant 0 : index
    %0 = vector.load %arg1[%c0, %c0_0] : memref<128x32xf32, #tpu.memory_space<vmem>>, vector<128x32xf32>
    %c0_1 = arith.constant 0 : index
    %c0_2 = arith.constant 0 : index
    %1 = vector.load %arg2[%c0_1, %c0_2] : memref<32x32xf32, #tpu.memory_space<vmem>>, vector<32x32xf32>
    %cst = arith.constant dense<0.000000e+00> : vector<128x32xf32>
    %2 = tpu.matmul %0, %1, %cst {dimension_numbers = #tpu.dot_dimension_numbers<[1], [0], [0], [1], [0, 0, 1, 1], [], []>} : vector<128x32xf32>, vector<32x32xf32>, vector<128x32xf32> -> vector<128x32xf32>
    %c0_3 = arith.constant 0 : index
    %c0_4 = arith.constant 0 : index
    %3 = vector.load %arg3[%c0_3, %c0_4] : memref<1x32xf32, #tpu.memory_space<vmem>>, vector<1x32xf32>
    %4 = vector.broadcast %3 : vector<1x32xf32> to vector<128x32xf32>
    %5 = arith.addf %2, %4 : vector<128x32xf32>
    %6 = math.tanh %5 : vector<128x32xf32>
    %c0_5 = arith.constant 0 : index
    %c0_6 = arith.constant 0 : index
    %7 = vector.load %arg4[%c0_5, %c0_6] : memref<32x32xf32, #tpu.memory_space<vmem>>, vector<32x32xf32>
    %cst_7 = arith.constant dense<0.000000e+00> : vector<128x32xf32>
    %8 = tpu.matmul %6, %7, %cst_7 {dimension_numbers = #tpu.dot_dimension_numbers<[1], [0], [0], [1], [0, 0, 1, 1], [], []>} : vector<128x32xf32>, vector<32x32xf32>, vector<128x32xf32> -> vector<128x32xf32>
    %c0_8 = arith.constant 0 : index
    %c0_9 = arith.constant 0 : index
    %9 = vector.load %arg5[%c0_8, %c0_9] : memref<1x32xf32, #tpu.memory_space<vmem>>, vector<1x32xf32>
    %10 = vector.broadcast %9 : vector<1x32xf32> to vector<128x32xf32>
    %11 = arith.addf %8, %10 : vector<128x32xf32>
    %12 = math.tanh %11 : vector<128x32xf32>
    %c0_10 = arith.constant 0 : index
    %c0_11 = arith.constant 0 : index
    %13 = vector.load %arg6[%c0_10, %c0_11] : memref<32x128xf32, #tpu.memory_space<vmem>>, vector<32x128xf32>
    %cst_12 = arith.constant dense<0.000000e+00> : vector<128x128xf32>
    %14 = tpu.matmul %12, %13, %cst_12 {dimension_numbers = #tpu.dot_dimension_numbers<[1], [0], [0], [1], [0, 0, 1, 1], [], []>} : vector<128x32xf32>, vector<32x128xf32>, vector<128x128xf32> -> vector<128x128xf32>
    %c0_13 = arith.constant 0 : index
    %c0_14 = arith.constant 0 : index
    %15 = vector.load %arg7[%c0_13, %c0_14] : memref<1x128xf32, #tpu.memory_space<vmem>>, vector<1x128xf32>
    %16 = vector.broadcast %15 : vector<1x128xf32> to vector<128x128xf32>
    %17 = arith.addf %14, %16 : vector<128x128xf32>
    %c0_15 = arith.constant 0 : index
    %c0_16 = arith.constant 0 : index
    %18 = vector.load %arg10[%c0_15, %c0_16] : memref<128x128xf32, #tpu.memory_space<vmem>>, vector<128x128xf32>
    tpu.vector_store %arg10[%c0_15, %c0_16], %17 {strides = array<i32>} : memref<128x128xf32, #tpu.memory_space<vmem>>, vector<128x128xf32>,
    %c0_17 = arith.constant 0 : index
    %c0_18 = arith.constant 0 : index
    %19 = vector.load %arg8[%c0_17, %c0_18] : memref<32x32xf32, #tpu.memory_space<vmem>>, vector<32x32xf32>
    %cst_19 = arith.constant dense<0.000000e+00> : vector<128x32xf32>
    %20 = tpu.matmul %6, %19, %cst_19 {dimension_numbers = #tpu.dot_dimension_numbers<[1], [0], [0], [1], [0, 0, 1, 1], [], []>} : vector<128x32xf32>, vector<32x32xf32>, vector<128x32xf32> -> vector<128x32xf32>
    %c0_20 = arith.constant 0 : index
    %c0_21 = arith.constant 0 : index
    %21 = vector.load %arg9[%c0_20, %c0_21] : memref<32x32xf32, #tpu.memory_space<vmem>>, vector<32x32xf32>
    %cst_22 = arith.constant dense<0.000000e+00> : vector<128x32xf32>
    %22 = tpu.matmul %6, %21, %cst_22 {dimension_numbers = #tpu.dot_dimension_numbers<[1], [0], [0], [1], [0, 0, 1, 1], [], []>} : vector<128x32xf32>, vector<32x32xf32>, vector<128x32xf32> -> vector<128x32xf32>
    %23 = vector.shape_cast %20 : vector<128x32xf32> to vector<16x8x32xf32>
    %24 = vector.shape_cast %22 : vector<128x32xf32> to vector<16x8x32xf32>
    "tpu.trace_start"() <{level = 10 : i32, message = "bqa,bka->bqk"}> : () -> ()
    %cst_23 = arith.constant dense<0.000000e+00> : vector<16x8x8xf32>
    %25 = tpu.matmul %23, %24, %cst_23 {dimension_numbers = #tpu.dot_dimension_numbers<[2], [2], [1], [1], [0, 0, 0, 1, 1, 1], [0], [0]>} : vector<16x8x32xf32>, vector<16x8x32xf32>, vector<16x8x8xf32> -> vector<16x8x8xf32>
    "tpu.trace_stop"() : () -> ()
    %c0_24 = arith.constant 0 : index
    %c0_25 = arith.constant 0 : index
    %c0_26 = arith.constant 0 : index
    %26 = vector.load %arg11[%c0_24, %c0_25, %c0_26] : memref<16x8x8xf32, #tpu.memory_space<vmem>>, vector<16x8x8xf32>
    tpu.vector_store %arg11[%c0_24, %c0_25, %c0_26], %25 {strides = array<i32>} : memref<16x8x8xf32, #tpu.memory_space<vmem>>, vector<16x8x8xf32>,
    return
  }
  func.func @transform_0(%arg0: i32) -> (i32, i32) {
    %c0_i32 = arith.constant 0 : i32
    %c0_i32_0 = arith.constant 0 : i32
    return %arg0, %c0_i32 : i32, i32
  }
  func.func @transform_1(%arg0: i32) -> (i32, i32) {
    %c0_i32 = arith.constant 0 : i32
    %c0_i32_0 = arith.constant 0 : i32
    %c0_i32_1 = arith.constant 0 : i32
    return %c0_i32, %c0_i32_0 : i32, i32
  }
  func.func @transform_2(%arg0: i32) -> (i32, i32) {
    %c0_i32 = arith.constant 0 : i32
    %c0_i32_0 = arith.constant 0 : i32
    %c0_i32_1 = arith.constant 0 : i32
    return %c0_i32, %c0_i32_0 : i32, i32
  }
  func.func @transform_3(%arg0: i32) -> (i32, i32) {
    %c0_i32 = arith.constant 0 : i32
    %c0_i32_0 = arith.constant 0 : i32
    %c0_i32_1 = arith.constant 0 : i32
    return %c0_i32, %c0_i32_0 : i32, i32
  }
  func.func @transform_4(%arg0: i32) -> (i32, i32) {
    %c0_i32 = arith.constant 0 : i32
    %c0_i32_0 = arith.constant 0 : i32
    %c0_i32_1 = arith.constant 0 : i32
    return %c0_i32, %c0_i32_0 : i32, i32
  }
  func.func @transform_5(%arg0: i32) -> (i32, i32) {
    %c0_i32 = arith.constant 0 : i32
    %c0_i32_0 = arith.constant 0 : i32
    %c0_i32_1 = arith.constant 0 : i32
    return %c0_i32, %c0_i32_0 : i32, i32
  }
  func.func @transform_6(%arg0: i32) -> (i32, i32) {
    %c0_i32 = arith.constant 0 : i32
    %c0_i32_0 = arith.constant 0 : i32
    %c0_i32_1 = arith.constant 0 : i32
    return %c0_i32, %c0_i32_0 : i32, i32
  }
  func.func @transform_7(%arg0: i32) -> (i32, i32) {
    %c0_i32 = arith.constant 0 : i32
    %c0_i32_0 = arith.constant 0 : i32
    %c0_i32_1 = arith.constant 0 : i32
    return %c0_i32, %c0_i32_0 : i32, i32
  }
  func.func @transform_8(%arg0: i32) -> (i32, i32) {
    %c0_i32 = arith.constant 0 : i32
    %c0_i32_0 = arith.constant 0 : i32
    %c0_i32_1 = arith.constant 0 : i32
    return %c0_i32, %c0_i32_0 : i32, i32
  }
  func.func @transform_9(%arg0: i32) -> (i32, i32) {
    %c0_i32 = arith.constant 0 : i32
    %c0_i32_0 = arith.constant 0 : i32
    return %arg0, %c0_i32 : i32, i32
  }
  func.func @transform_10(%arg0: i32) -> (i32, i32, i32) {
    %c0_i32 = arith.constant 0 : i32
    %c0_i32_0 = arith.constant 0 : i32
    %c0_i32_1 = arith.constant 0 : i32
    return %arg0, %c0_i32, %c0_i32_0 : i32, i32, i32
  }
}

</mosaic_0001>

<bundles_post_ra>
// kernel: tpu_custom_call.1
= control target key start
LH: loop header
LB: loop body
LE: loop exit
PB: predicated region body
PF: predicated region fallthrough
CT: control target
= control target key end

     0   :  { %s3970_s0 = inlined_call_operand.vmem [shape: f32[256,32], index: 0, kind: input, shape index: {}]   ;;  %s3971_s1 = inlined_call_operand.vmem [shape: f32[32,32], index: 1, kind: input, shape index: {}]   ;;  %s3972_s2 = inlined_call_operand.vmem [shape: f32[1,32], index: 2, kind: input, shape index: {}]   ;;  %s3973_s3 = inlined_call_operand.vmem [shape: f32[32,32], index: 3, kind: input, shape index: {}]   ;;  %s3974_s4 = inlined_call_operand.vmem [shape: f32[1,32], index: 4, kind: input, shape index: {}]   ;;  %s3975_s5 = inlined_call_operand.vmem [shape: f32[32,128], index: 5, kind: input, shape index: {}]   ;;  %s3976_s6 = inlined_call_operand.vmem [shape: f32[1,128], index: 6, kind: input, shape index: {}]   ;;  %s3977_s7 = inlined_call_operand.vmem [shape: f32[32,32], index: 7, kind: input, shape index: {}]   ;;  %s3978_s8 = inlined_call_operand.vmem [shape: f32[32,32], index: 8, kind: input, shape index: {}]   ;;  %s3979_s9 = inlined_call_operand.hbm [shape: f32[256,128], index: 9, kind: output, shape index: {0}]   ;;  %s3980_s10 = inlined_call_operand.vmem [shape: f32[32,8,8], index: 10, kind: output, shape index: {1}]  }
   0x1   :  { %3982 = sst [smem:[#allocation5_spill]] %s3970_s0 }
   0x2   :  { %3983 = sst [smem:[#allocation6_spill]] %s3971_s1 }
   0x3   :  { %16 = vsyncpa [#allocation3], 0 }
   0x4   :  { %18 = vsyncpa [#allocation3 + $0x1], 0  ;;  %s3424_s13 = smov 0   ;;  %s3426_s14 = smov 0  }
   0x5   :  { %s3428_s15 = smov 0   ;;  %s3430_s16 = smov 0  }
   0x6 LB: > { %s3445_s17 = sadd.s32 4294967295, %s3362_s16   ;;  %s2693_s18 = sadd.s32 4294967294, %s3362_s16   ;;  %s3362_s16 = sphi %s3430_s16, %s3992_s16   ;;  %s3358_s15 = sphi %s3428_s15, %s3991_s15   ;;  %s3354_s14 = sphi %s3426_s14, %s3990_s14   ;;  %s3350_s13 = sphi %s3424_s13, %s3989_s13  }
   0x7   : > { %s3449_s19 = sadd.s32 1, %s3362_s16   ;;  %s225_s20 = sadd.s32 1, %s3358_s15 }
   0x8   : > { %s222_s21 = ssub.s32 %s3362_s16, %s3449_s19  ;;  %p235_p0 = scmp.ne.s32.totalorder %s3358_s15, %s3354_s14 }
   0x9   : > { %p223_p1 = scmp.eq.s32.totalorder %s222_s21, 0  ;;  %p236_p2 = scmp.eq.s32.totalorder %s3445_s17, 1 }
   0xa   : > { %p241_p3 = scmp.ne.s32.totalorder %s3354_s14, %s3350_s13  ;;  %p242_p4 = scmp.eq.s32.totalorder %s2693_s18, 1 }
   0xb   : > { %s3460_s22 = scalar_select %p223_p1, %s3358_s15, %s225_s20  }
   0xc   : > { %p3462_p5 = por %p236_p2, %p235_p0  ;;  %p3466_p6 = por %p242_p4, %p241_p3 }
   0xd   : > { %p2696_p7 = scmp.ge.s32.totalorder %s3362_s16, 1  ;;  %p319_p8 = scmp.lt.s32.totalorder %s3362_s16, 3 }
   0xf   : > { %p320_p9 = pnand %p2696_p7, %p319_p8 }
  0x10   : > { %s3986_s1 = sld [smem:[#allocation6_spill]] (!%p320_p9)  ;;  %s2698_s29 = sshll.u32 (!%p320_p9), %s3445_s17, 4 }
  0x11   : > { %323 = sbr.rel (%p320_p9) target bundleno = 924 (0x39c), region = 56  ;;  %p363_p10 = scmp.lt.s32.totalorder (!%p320_p9), %s2698_s29, 31 }
  0x12   : > { %s3987_s0 = sld [smem:[#allocation5_spill]] (!%p320_p9)  ;;  %s352_s27 = sand.u32 (!%p320_p9), 1, %s3354_s14  }
  0x13   : > { %s2697_s28 = sshll.u32 (!%p320_p9), %s352_s27, 7  ;;  %s2822_s18 = sshll.u32 (!%p320_p9), %s3445_s17, 11 }
  0x14   : > { %s3773_s12 = scalar_lea.vmem (!%p320_p9), [#allocation2], %s2697_s28  ;;  %s3885_s28 = scalar_lea.hbm (!%p320_p9), %s3979_s9, %s2822_s18 }
  0x15   : > { %s2602_s21 = sshll.u32 (!%p320_p9), %s3773_s12, 4  ;;  %s3891_s30 = scalar_lea.sflag (!%p320_p9), [#allocation3], %s352_s27  ;;  %s3887_s21 = int_to_ptr.vmem [resolvable:$true] %s2602_s21 }
  0x16   : > { %v394_v0 = vld [vmem:[%s3986_s1 + $0x18] sm:$0xff]  ;;  %v393_v1 = vld [vmem:[%s3986_s1 + $0x10] sm:$0xff]  ;;  %v392_v2 = vld [vmem:[%s3986_s1 + $0x8] sm:$0xff]  ;;  %s3994_s29 = smov (!%p363_p10, %s2698_s29), 31  ;;  %vm402_vm0 = vcmask 261120   ;;  %vm3365_vm1 = vmmov 0  }
  0x17   : > { %2955 = vmatprep.subr.mxu0 %v394_v0  ;;  %v391_v3 = vld [vmem:[%s3986_s1] sm:$0xff]  ;;  %s3981_s20 = sshll.u32 %s3994_s29, 3  ;;  %v615_v20 = vld [vmem:[%s3973_s3 + $0x18] sm:$0xff]  ;;  %v614_v21 = vld [vmem:[%s3973_s3 + $0x10] sm:$0xff]  ;;  %s3302_s11 = scalar_lea.vmem %s3887_s21, 2048 }
  0x18   : > { %2956 = vmatpush3.msra.mxu0 %v394_v0  ;;  %s3493_s26 = scalar_lea.vmem %s3987_s0, %s3981_s20  ;;  %2987 = vmatprep.subr.mxu1 %v615_v20  ;;  %v613_v22 = vld [vmem:[%s3973_s3 + $0x8] sm:$0xff]  ;;  %v612_v23 = vld [vmem:[%s3973_s3] sm:$0xff]  ;;  %v1055_v24 = vld [vmem:[%s3977_s7 + $0x18] sm:$0xff]  ;;  %p3303_p11 = scmp.ne.s32.totalorder %s3887_s21, %s3302_s11 }
  0x19   : > { %2957 = vmatprep.subr.mxu0 %v393_v1  ;;  %v375_v4 = vld [vmem:[%s3493_s26] sm:$0xff]  ;;  %v376_v5 = vld [vmem:[%s3493_s26 + $0x8] sm:$0xff]  ;;  %v377_v6 = vld [vmem:[%s3493_s26 + $0x10] sm:$0xff]  ;;  %2988 = vmatpush3.msra.mxu1 %v615_v20  ;;  %s3366_s17 = smov [#allocation2]  }
  0x1a   : > { %2958 = vmatpush3.msra.mxu0 %v393_v1  ;;  %2963 = vmatprep.mubr.msk.f32.mxu0 %vm402_vm0, %v375_v4  ;;  %v378_v7 = vld [vmem:[%s3493_s26 + $0x18] sm:$0xff]  ;;  %v379_v8 = vld [vmem:[%s3493_s26 + $0x20] sm:$0xff]  ;;  %v380_v9 = vld [vmem:[%s3493_s26 + $0x28] sm:$0xff]  ;;  %p3304_p12 = pnand %p3303_p11, %p3462_p5 }
  0x1b   : > { %2959 = vmatprep.subr.mxu0 %v392_v2  ;;  %v381_v10 = vld [vmem:[%s3493_s26 + $0x30] sm:$0xff]  ;;  %v382_v11 = vld [vmem:[%s3493_s26 + $0x38] sm:$0xff]  ;;  %v383_v12 = vld [vmem:[%s3493_s26 + $0x40] sm:$0xff]  ;;  %2989 = vmatprep.subr.mxu1 %v614_v21 }
  0x1c   : > { %2960 = vmatpush3.msra.mxu0 %v392_v2  ;;  %v384_v13 = vld [vmem:[%s3493_s26 + $0x48] sm:$0xff]  ;;  %v385_v14 = vld [vmem:[%s3493_s26 + $0x50] sm:$0xff]  ;;  %v386_v15 = vld [vmem:[%s3493_s26 + $0x58] sm:$0xff]  ;;  %2990 = vmatpush3.msra.mxu1 %v614_v21  ;;  %p3305_p13 = pneg %p3304_p12 }
  0x1d   : > { %2961 = vmatprep.subr.mxu0 %v391_v3  ;;  %v387_v16 = vld [vmem:[%s3493_s26 + $0x60] sm:$0xff]  ;;  %v388_v17 = vld [vmem:[%s3493_s26 + $0x68] sm:$0xff]  ;;  %v389_v18 = vld [vmem:[%s3493_s26 + $0x70] sm:$0xff]  ;;  %2991 = vmatprep.subr.mxu1 %v613_v22 }
  0x1e   : > { %2962 = vmatpush3.msra.mxu0 %v391_v3  ;;  %v390_v19 = vld [vmem:[%s3493_s26 + $0x78] sm:$0xff]  ;;  %2992 = vmatpush3.msra.mxu1 %v613_v22  ;;  %v3545_v25 = vld [vmem:[%s3972_s2] ss:$0 sm:$0xff]  ;;  %v1054_v48 = vld [vmem:[%s3977_s7 + $0x10] sm:$0xff] }
  0x1f   : > { %2964 = vmatmul.mubr.msk.f32.vlgmr.msra.gmra.mxu0 %vm402_vm0, %v376_v5  ;;  %2993 = vmatprep.subr.mxu1 %v612_v23  ;;  %v1053_v50 = vld [vmem:[%s3977_s7 + $0x8] sm:$0xff]  ;;  %v1052_v56 = vld [vmem:[%s3977_s7] sm:$0xff] }
  0x20   : > { %2966 = vmatprep.mubr.msk.f32.mxu0 %vm402_vm0, %v377_v6  ;;  %2994 = vmatpush3.msra.mxu1 %v612_v23 }
  0x21   : > { %3051 = vmatprep.subr.mxu1 %v1055_v24 }
  0x23   : > { %2967 = vmatmul.mubr.msk.f32.gmra.mxu0 %vm402_vm0, %v378_v7 }
  0x24   : > { %2969 = vmatprep.mubr.msk.f32.mxu0 %vm402_vm0, %v379_v8 }
  0x27   : > { %2970 = vmatmul.mubr.msk.f32.gmra.mxu0 %vm402_vm0, %v380_v9 }
  0x28   : > { %2972 = vmatprep.mubr.msk.f32.mxu0 %vm402_vm0, %v381_v10 }
  0x2b   : > { %2973 = vmatmul.mubr.msk.f32.gmra.mxu0 %vm402_vm0, %v382_v11 }
  0x2c   : > { %2975 = vmatprep.mubr.msk.f32.mxu0 %vm402_vm0, %v383_v12 }
  0x2f   : > { %2976 = vmatmul.mubr.msk.f32.gmra.mxu0 %vm402_vm0, %v384_v13  ;;  %v835_v13 = vld [vmem:[%s3975_s5 + $0x18] sm:$0xff] }
  0x30   : > { %2978 = vmatprep.mubr.msk.f32.mxu0 %vm402_vm0, %v385_v14  ;;  %3019 = vmatprep.subr.mxu0 %v835_v13  ;;  %v834_v14 = vld [vmem:[%s3975_s5 + $0x10] sm:$0xff] }
  0x31   : > { %3020 = vmatpush3.msra.mxu0 %v835_v13 }
  0x32   : > { %3021 = vmatprep.subr.mxu0 %v834_v14 }
  0x33   : > { %2979 = vmatmul.mubr.msk.f32.gmra.mxu0 %vm402_vm0, %v386_v15  ;;  %v833_v15 = vld [vmem:[%s3975_s5 + $0x8] sm:$0xff] }
  0x34   : > { %2981 = vmatprep.mubr.msk.f32.mxu0 %vm402_vm0, %v387_v16  ;;  %3022 = vmatpush3.msra.mxu0 %v834_v14  ;;  %v832_v16 = vld [vmem:[%s3975_s5] sm:$0xff] }
  0x35   : > { %3023 = vmatprep.subr.mxu0 %v833_v15 }
  0x36   : > { %3024 = vmatpush3.msra.mxu0 %v833_v15 }
  0x37   : > { %2982 = vmatmul.mubr.msk.f32.gmra.mxu0 %vm402_vm0, %v388_v17  ;;  %3025 = vmatprep.subr.mxu0 %v832_v16  ;;  %v1204_v17 = vld [vmem:[%s3978_s8 + $0x18] sm:$0xff] }
  0x38   : > { %2984 = vmatprep.mubr.msk.f32.mxu0 %vm402_vm0, %v389_v18  ;;  %3026 = vmatpush3.msra.mxu0 %v832_v16  ;;  %v3686_v18 = vld [vmem:[%s3974_s4] ss:$0 sm:$0xff] }
  0x39   : > { %3083 = vmatprep.subr.mxu0 %v1204_v17 }
  0x3b   : > { %2985 = vmatmul.mubr.msk.f32.gmra.mxu0 %vm402_vm0, %v390_v19 }
  0xdf   : > { %v2965_v26 = vpop.f32.mrf.mxu0 }
  0xe0   : > { %v523_v27 = vadd.f32 %v2965_v26, %v3545_v25 }
  0xe1   : > { %v517_v28 = vpop.f32.mrf.mxu0 }
  0xe2   : > { %v518_v29 = vadd.f32 %v3545_v25, %v517_v28 }
  0xe3   : > { %v2968_v30 = vpop.f32.mrf.mxu0 }
  0xe4   : > { %3238 = vtanh.f32 %v518_v29  ;;  %v533_v31 = vadd.f32 %v2968_v30, %v3545_v25 }
  0xe5   : > { %3240 = vtanh.f32 %v523_v27  ;;  %v527_v32 = vpop.f32.mrf.mxu0 }
  0xe6   : > { %v528_v33 = vadd.f32 %v3545_v25, %v527_v32 }
  0xe7   : > { %v2971_v34 = vpop.f32.mrf.mxu0 }
  0xe8   : > { %3242 = vtanh.f32 %v528_v33  ;;  %v543_v35 = vadd.f32 %v2971_v34, %v3545_v25 }
  0xe9   : > { %3244 = vtanh.f32 %v533_v31  ;;  %v537_v36 = vpop.f32.mrf.mxu0 }
  0xea   : > { %v538_v37 = vadd.f32 %v3545_v25, %v537_v36 }
  0xeb   : > { %v2974_v38 = vpop.f32.mrf.mxu0 }
  0xec   : > { %3246 = vtanh.f32 %v538_v37  ;;  %v553_v39 = vadd.f32 %v2974_v38, %v3545_v25 }
  0xed   : > { %3248 = vtanh.f32 %v543_v35  ;;  %v547_v40 = vpop.f32.mrf.mxu0 }
  0xee   : > { %v548_v41 = vadd.f32 %v3545_v25, %v547_v40 }
  0xef   : > { %v2977_v42 = vpop.f32.mrf.mxu0 }
  0xf0   : > { %3250 = vtanh.f32 %v548_v41  ;;  %v563_v44 = vadd.f32 %v2977_v42, %v3545_v25  ;;  %v1203_v41 = vld [vmem:[%s3978_s8 + $0x10] sm:$0xff] }
  0xf1   : > { %v3555_v43 = vpop.eup %3238  ;;  %3252 = vtanh.f32 %v553_v39  ;;  %v557_v45 = vpop.f32.mrf.mxu0 }
  0xf2   : > { %v3558_v46 = vpop.eup %3240  ;;  %v558_v47 = vadd.f32 %v3545_v25, %v557_v45  ;;  %2995 = vmatprep.mubr.msk.f32.mxu1 %vm402_vm0, %v3555_v43 }
  0xf3   : > { %v2980_v49 = vpop.f32.mrf.mxu0  ;;  %2996 = vmatmul.mubr.msk.f32.vlgmr.msra.gmra.mxu1 %vm402_vm0, %v3558_v46 }
  0xf4   : > { %3254 = vtanh.f32 %v558_v47  ;;  %3052 = vmatpush3.msra.mxu1 %v1055_v24  ;;  %v573_v52 = vadd.f32 %v2980_v49, %v3545_v25 }
  0xf5   : > { %v3571_v51 = vpop.eup %3242  ;;  %3256 = vtanh.f32 %v563_v44  ;;  %v567_v53 = vpop.f32.mrf.mxu0  ;;  %3053 = vmatprep.subr.mxu1 %v1054_v48  ;;  %v1202_v44 = vld [vmem:[%s3978_s8 + $0x8] sm:$0xff] }
  0xf6   : > { %v3574_v54 = vpop.eup %3244  ;;  %v568_v55 = vadd.f32 %v3545_v25, %v567_v53  ;;  %2998 = vmatprep.mubr.msk.f32.mxu1 %vm402_vm0, %v3571_v51  ;;  %3054 = vmatpush3.msra.mxu1 %v1054_v48 }
  0xf7   : > { %v2983_v57 = vpop.f32.mrf.mxu0  ;;  %2999 = vmatmul.mubr.msk.f32.gmra.mxu1 %vm402_vm0, %v3574_v54  ;;  %3055 = vmatprep.subr.mxu1 %v1053_v50 }
  0xf8   : > { %3258 = vtanh.f32 %v568_v55  ;;  %3056 = vmatpush3.msra.mxu1 %v1053_v50  ;;  %v583_v59 = vadd.f32 %v2983_v57, %v3545_v25 }
  0xf9   : > { %v3584_v58 = vpop.eup %3246  ;;  %3260 = vtanh.f32 %v573_v52  ;;  %v577_v60 = vpop.f32.mrf.mxu0  ;;  %3057 = vmatprep.subr.mxu1 %v1052_v56  ;;  %v1201_v52 = vld [vmem:[%s3978_s8] sm:$0xff] }
  0xfa   : > { %v3587_v61 = vpop.eup %3248  ;;  %v578_v62 = vadd.f32 %v3545_v25, %v577_v60  ;;  %3001 = vmatprep.mubr.msk.f32.mxu1 %vm402_vm0, %v3584_v58  ;;  %3058 = vmatpush3.msra.mxu1 %v1052_v56 }
  0xfb   : > { %v2986_v63 = vpop.f32.mrf.mxu0  ;;  %3002 = vmatmul.mubr.msk.f32.gmra.mxu1 %vm402_vm0, %v3587_v61 }
  0xfc   : > { %3262 = vtanh.f32 %v578_v62  ;;  %v593_v1 = vadd.f32 %v2986_v63, %v3545_v25 }
  0xfd   : > { %v3594_v0 = vpop.eup %3250  ;;  %3264 = vtanh.f32 %v583_v59  ;;  %v587_v2 = vpop.f32.mrf.mxu0 }
  0xfe   : > { %v3597_v3 = vpop.eup %3252  ;;  %v588_v4 = vadd.f32 %v3545_v25, %v587_v2  ;;  %3004 = vmatprep.mubr.msk.f32.mxu1 %vm402_vm0, %v3594_v0 }
  0xff   : > { %3005 = vmatmul.mubr.msk.f32.gmra.mxu1 %vm402_vm0, %v3597_v3 }
 0x100   : > { %3266 = vtanh.f32 %v588_v4 }
 0x101   : > { %v3604_v5 = vpop.eup %3254  ;;  %3268 = vtanh.f32 %v593_v1 }
 0x102   : > { %v3606_v6 = vpop.eup %3256  ;;  %3007 = vmatprep.mubr.msk.f32.mxu1 %vm402_vm0, %v3604_v5 }
 0x103   : > { %3008 = vmatmul.mubr.msk.f32.gmra.mxu1 %vm402_vm0, %v3606_v6 }
 0x105   : > { %v3612_v7 = vpop.eup %3258 }
 0x106   : > { %v3614_v8 = vpop.eup %3260  ;;  %3010 = vmatprep.mubr.msk.f32.mxu1 %vm402_vm0, %v3612_v7 }
 0x107   : > { %3011 = vmatmul.mubr.msk.f32.gmra.mxu1 %vm402_vm0, %v3614_v8 }
 0x109   : > { %v3620_v9 = vpop.eup %3262 }
 0x10a   : > { %v3622_v10 = vpop.eup %3264  ;;  %3013 = vmatprep.mubr.msk.f32.mxu1 %vm402_vm0, %v3620_v9 }
 0x10b   : > { %3014 = vmatmul.mubr.msk.f32.gmra.mxu1 %vm402_vm0, %v3622_v10 }
 0x10d   : > { %v3628_v11 = vpop.eup %3266 }
 0x10e   : > { %v3630_v12 = vpop.eup %3268  ;;  %3016 = vmatprep.mubr.msk.f32.mxu1 %vm402_vm0, %v3628_v11 }
 0x10f   : > { %3017 = vmatmul.mubr.msk.f32.gmra.mxu1 %vm402_vm0, %v3630_v12 }
 0x110   : > { %3059 = vmatprep.mubr.msk.f32.mxu1 %vm402_vm0, %v3555_v43 }
 0x113   : > { %3060 = vmatmul.mubr.msk.f32.vlgmr.msra.gmra.mxu1 %vm402_vm0, %v3558_v46 }
 0x114   : > { %3062 = vmatprep.mubr.msk.f32.mxu1 %vm402_vm0, %v3571_v51 }
 0x117   : > { %3063 = vmatmul.mubr.msk.f32.gmra.mxu1 %vm402_vm0, %v3574_v54 }
 0x118   : > { %3065 = vmatprep.mubr.msk.f32.mxu1 %vm402_vm0, %v3584_v58 }
 0x11b   : > { %3066 = vmatmul.mubr.msk.f32.gmra.mxu1 %vm402_vm0, %v3587_v61 }
 0x11c   : > { %3068 = vmatprep.mubr.msk.f32.mxu1 %vm402_vm0, %v3594_v0 }
 0x11f   : > { %3069 = vmatmul.mubr.msk.f32.gmra.mxu1 %vm402_vm0, %v3597_v3 }
 0x120   : > { %3071 = vmatprep.mubr.msk.f32.mxu1 %vm402_vm0, %v3604_v5 }
 0x123   : > { %3072 = vmatmul.mubr.msk.f32.gmra.mxu1 %vm402_vm0, %v3606_v6 }
 0x124   : > { %3074 = vmatprep.mubr.msk.f32.mxu1 %vm402_vm0, %v3612_v7 }
 0x127   : > { %3075 = vmatmul.mubr.msk.f32.gmra.mxu1 %vm402_vm0, %v3614_v8 }
 0x128   : > { %3077 = vmatprep.mubr.msk.f32.mxu1 %vm402_vm0, %v3620_v9 }
 0x12b   : > { %3078 = vmatmul.mubr.msk.f32.gmra.mxu1 %vm402_vm0, %v3622_v10 }
 0x12c   : > { %3080 = vmatprep.mubr.msk.f32.mxu1 %vm402_vm0, %v3628_v11 }
 0x12f   : > { %3081 = vmatmul.mubr.msk.f32.gmra.mxu1 %vm402_vm0, %v3630_v12 }
 0x1b3   : > { %v2997_v19 = vpop.f32.mrf.mxu1 }
 0x1b4   : > { %v743_v20 = vadd.f32 %v2997_v19, %v3686_v18 }
 0x1b5   : > { %v737_v21 = vpop.f32.mrf.mxu1 }
 0x1b6   : > { %v738_v22 = vadd.f32 %v3686_v18, %v737_v21 }
 0x1b7   : > { %v3000_v23 = vpop.f32.mrf.mxu1 }
 0x1b8   : > { %3270 = vtanh.f32 %v738_v22  ;;  %v753_v24 = vadd.f32 %v3000_v23, %v3686_v18 }
 0x1b9   : > { %3272 = vtanh.f32 %v743_v20  ;;  %v747_v25 = vpop.f32.mrf.mxu1 }
 0x1ba   : > { %v748_v26 = vadd.f32 %v3686_v18, %v747_v25 }
 0x1bb   : > { %v3003_v27 = vpop.f32.mrf.mxu1 }
 0x1bc   : > { %3274 = vtanh.f32 %v748_v26  ;;  %v763_v28 = vadd.f32 %v3003_v27, %v3686_v18 }
 0x1bd   : > { %3276 = vtanh.f32 %v753_v24  ;;  %v757_v29 = vpop.f32.mrf.mxu1 }
 0x1be   : > { %v758_v30 = vadd.f32 %v3686_v18, %v757_v29 }
 0x1bf   : > { %v3006_v31 = vpop.f32.mrf.mxu1 }
 0x1c0   : > { %3278 = vtanh.f32 %v758_v30  ;;  %v773_v32 = vadd.f32 %v3006_v31, %v3686_v18 }
 0x1c1   : > { %3280 = vtanh.f32 %v763_v28  ;;  %v767_v33 = vpop.f32.mrf.mxu1 }
 0x1c2   : > { %v768_v34 = vadd.f32 %v3686_v18, %v767_v33 }
 0x1c3   : > { %v3009_v35 = vpop.f32.mrf.mxu1 }
 0x1c4   : > { %3282 = vtanh.f32 %v768_v34  ;;  %v783_v37 = vadd.f32 %v3009_v35, %v3686_v18 }
 0x1c5   : > { %v3271_v36 = vpop.eup %3270  ;;  %3284 = vtanh.f32 %v773_v32  ;;  %v777_v38 = vpop.f32.mrf.mxu1 }
 0x1c6   : > { %v3273_v39 = vpop.eup %3272  ;;  %v778_v40 = vadd.f32 %v3686_v18, %v777_v38  ;;  %3027 = vmatprep.mubr.msk.f32.mxu0 %vm402_vm0, %v3271_v36 }
 0x1c7   : > { %v3012_v42 = vpop.f32.mrf.mxu1  ;;  %3028 = vmatmul.mubr.msk.f32.vlgmr.msra.gmra.mxu0 %vm402_vm0, %v3273_v39 }
 0x1c8   : > { %3286 = vtanh.f32 %v778_v40  ;;  %3084 = vmatpush3.msra.mxu0 %v1204_v17  ;;  %v793_v47 = vadd.f32 %v3012_v42, %v3686_v18 }
 0x1c9   : > { %v3275_v45 = vpop.eup %3274  ;;  %3288 = vtanh.f32 %v783_v37  ;;  %v787_v48 = vpop.f32.mrf.mxu1  ;;  %3085 = vmatprep.subr.mxu0 %v1203_v41 }
 0x1ca   : > { %v3277_v49 = vpop.eup %3276  ;;  %v788_v50 = vadd.f32 %v3686_v18, %v787_v48  ;;  %3030 = vmatprep.mubr.msk.f32.mxu0 %vm402_vm0, %v3275_v45  ;;  %3086 = vmatpush3.msra.mxu0 %v1203_v41 }
 0x1cb   : > { %v3015_v53 = vpop.f32.mrf.mxu1  ;;  %3031 = vmatmul.mubr.msk.f32.gmra.mxu0 %vm402_vm0, %v3277_v49  ;;  %3087 = vmatprep.subr.mxu0 %v1202_v44 }
 0x1cc   : > { %3290 = vtanh.f32 %v788_v50  ;;  %3088 = vmatpush3.msra.mxu0 %v1202_v44  ;;  %v803_v56 = vadd.f32 %v3015_v53, %v3686_v18 }
 0x1cd   : > { %v3279_v55 = vpop.eup %3278  ;;  %3292 = vtanh.f32 %v793_v47  ;;  %v797_v57 = vpop.f32.mrf.mxu1  ;;  %3089 = vmatprep.subr.mxu0 %v1201_v52 }
 0x1ce   : > { %v3281_v59 = vpop.eup %3280  ;;  %v798_v60 = vadd.f32 %v3686_v18, %v797_v57  ;;  %3033 = vmatprep.mubr.msk.f32.mxu0 %vm402_vm0, %v3279_v55  ;;  %3090 = vmatpush3.msra.mxu0 %v1201_v52 }
 0x1cf   : > { %v3018_v62 = vpop.f32.mrf.mxu1  ;;  %3034 = vmatmul.mubr.msk.f32.gmra.mxu0 %vm402_vm0, %v3281_v59 }
 0x1d0   : > { %3294 = vtanh.f32 %v798_v60  ;;  %v813_v1 = vadd.f32 %v3018_v62, %v3686_v18 }
 0x1d1   : > { %v3283_v63 = vpop.eup %3282  ;;  %3296 = vtanh.f32 %v803_v56  ;;  %v807_v2 = vpop.f32.mrf.mxu1 }
 0x1d2   : > { %v3285_v4 = vpop.eup %3284  ;;  %v808_v13 = vadd.f32 %v3686_v18, %v807_v2  ;;  %3036 = vmatprep.mubr.msk.f32.mxu0 %vm402_vm0, %v3283_v63 }
 0x1d3   : > { %3037 = vmatmul.mubr.msk.f32.gmra.mxu0 %vm402_vm0, %v3285_v4 }
 0x1d4   : > { %3298 = vtanh.f32 %v808_v13 }
 0x1d5   : > { %v3287_v14 = vpop.eup %3286  ;;  %3300 = vtanh.f32 %v813_v1 }
 0x1d6   : > { %v3289_v15 = vpop.eup %3288  ;;  %3039 = vmatprep.mubr.msk.f32.mxu0 %vm402_vm0, %v3287_v14 }
 0x1d7   : > { %3040 = vmatmul.mubr.msk.f32.gmra.mxu0 %vm402_vm0, %v3289_v15 }
 0x1d9   : > { %v3291_v16 = vpop.eup %3290 }
 0x1da   : > { %v3293_v17 = vpop.eup %3292  ;;  %3042 = vmatprep.mubr.msk.f32.mxu0 %vm402_vm0, %v3291_v16 }
 0x1db   : > { %3043 = vmatmul.mubr.msk.f32.gmra.mxu0 %vm402_vm0, %v3293_v17 }
 0x1dd   : > { %v3295_v19 = vpop.eup %3294 }
 0x1de   : > { %v3297_v18 = vpop.eup %3296  ;;  %3045 = vmatprep.mubr.msk.f32.mxu0 %vm402_vm0, %v3295_v19 }
 0x1df   : > { %3046 = vmatmul.mubr.msk.f32.gmra.mxu0 %vm402_vm0, %v3297_v18 }
 0x1e1   : > { %v3299_v20 = vpop.eup %3298 }
 0x1e2   : > { %v3301_v21 = vpop.eup %3300  ;;  %3048 = vmatprep.mubr.msk.f32.mxu0 %vm402_vm0, %v3299_v20 }
 0x1e3   : > { %3049 = vmatmul.mubr.msk.f32.gmra.mxu0 %vm402_vm0, %v3301_v21 }
 0x1e4   : > { %3091 = vmatprep.mubr.msk.f32.mxu0 %vm402_vm0, %v3555_v43  ;;  %v3364_v43 = vmov 0.0  }
 0x1e5   : > { %3115 = vmatprep.subr.mxu1 %v3364_v43  ;;  %3155 = vmatprep.subr.mxu0 %v3364_v43 }
 0x1e6   : > { %3117 = vmatprep.mubr.msk.f32.mxu1 %vm3365_vm1, %v3364_v43 }
 0x1e7   : > { %3092 = vmatmul.mubr.msk.f32.vlgmr.msra.gmra.mxu0 %vm402_vm0, %v3558_v46  ;;  %v2736_v46 = vld [vmem:[%s3976_s6] ss:$0 sm:$0xff] }
 0x1e8   : > { %3094 = vmatprep.mubr.msk.f32.mxu0 %vm402_vm0, %v3571_v51 }
 0x1eb   : > { %3095 = vmatmul.mubr.msk.f32.gmra.mxu0 %vm402_vm0, %v3574_v54 }
 0x1ec   : > { %3097 = vmatprep.mubr.msk.f32.mxu0 %vm402_vm0, %v3584_v58 }
 0x1ef   : > { %3098 = vmatmul.mubr.msk.f32.gmra.mxu0 %vm402_vm0, %v3587_v61 }
 0x1f0   : > { %3100 = vmatprep.mubr.msk.f32.mxu0 %vm402_vm0, %v3594_v0 }
 0x1f3   : > { %3101 = vmatmul.mubr.msk.f32.gmra.mxu0 %vm402_vm0, %v3597_v3  ;;  %v3776_v3 = vpop.f32.mrf.mxu1 }
 0x1f4   : > { %3103 = vmatprep.mubr.msk.f32.mxu0 %vm402_vm0, %v3604_v5 }
 0x1f7   : > { %3104 = vmatmul.mubr.msk.f32.gmra.mxu0 %vm402_vm0, %v3606_v6 }
 0x1f8   : > { %3106 = vmatprep.mubr.msk.f32.mxu0 %vm402_vm0, %v3612_v7 }
 0x1fb   : > { %3107 = vmatmul.mubr.msk.f32.gmra.mxu0 %vm402_vm0, %v3614_v8 }
 0x1fc   : > { %3109 = vmatprep.mubr.msk.f32.mxu0 %vm402_vm0, %v3620_v9  ;;  %v1122_v9 = vpop.f32.mrf.mxu1 }
 0x1fe   : > { %v3782_v23 = vpop.f32.mrf.mxu1 }
 0x1ff   : > { %3110 = vmatmul.mubr.msk.f32.gmra.mxu0 %vm402_vm0, %v3622_v10 }
 0x200   : > { %3112 = vmatprep.mubr.msk.f32.mxu0 %vm402_vm0, %v3628_v11  ;;  %v1132_v28 = vpop.f32.mrf.mxu1 }
 0x202   : > { %v3788_v33 = vpop.f32.mrf.mxu1 }
 0x203   : > { %3113 = vmatmul.mubr.msk.f32.gmra.mxu0 %vm402_vm0, %v3630_v12 }
 0x204   : > { %3157 = vmatprep.mubr.msk.f32.mxu0 %vm3365_vm1, %v3364_v43  ;;  %v1142_v38 = vpop.f32.mrf.mxu1 }
 0x206   : > { %v3794_v44 = vpop.f32.mrf.mxu1 }
 0x208   : > { %v1152_v50 = vpop.f32.mrf.mxu1 }
 0x20a   : > { %v3801_v55 = vpop.f32.mrf.mxu1 }
 0x20c   : > { %v1162_v59 = vpop.f32.mrf.mxu1 }
 0x20e   : > { %v3076_v63 = vpop.f32.mrf.mxu1 }
 0x210   : > { %v1172_v4 = vpop.f32.mrf.mxu1 }
 0x212   : > { %v3079_v15 = vpop.f32.mrf.mxu1 }
 0x214   : > { %v1182_v19 = vpop.f32.mrf.mxu1 }
 0x216   : > { %v3082_v21 = vpop.f32.mrf.mxu1 }
 0x287   : > { %v3029_v51 = vpop.f32.mrf.mxu0 }
 0x288   : > { %v963_v54 = vadd.f32 %v3029_v51, %v2736_v46  ;;  %v1192_v51 = vpop.f32.mrf.mxu1 }
 0x289   : > { %v957_v58 = vpop.f32.mrf.mxu0 }
 0x28a   : > { %1037 = vst [vmem:[%s3773_s12 + $0x8] sm:$0xff] %v963_v54  ;;  %v958_v61 = vadd.f32 %v2736_v46, %v957_v58 }
 0x28b   : > { %v3032_v0 = vpop.f32.mrf.mxu0 }
 0x28c   : > { %1036 = vst [vmem:[%s3773_s12] sm:$0xff] %v958_v61  ;;  %v973_v5 = vadd.f32 %v3032_v0, %v2736_v46 }
 0x28d   : > { %v967_v6 = vpop.f32.mrf.mxu0 }
 0x28e   : > { %1039 = vst [vmem:[%s3773_s12 + $0x18] sm:$0xff] %v973_v5  ;;  %v968_v7 = vadd.f32 %v2736_v46, %v967_v6 }
 0x28f   : > { %v3035_v8 = vpop.f32.mrf.mxu0 }
 0x290   : > { %1038 = vst [vmem:[%s3773_s12 + $0x10] sm:$0xff] %v968_v7  ;;  %v983_v10 = vadd.f32 %v3035_v8, %v2736_v46 }
 0x291   : > { %v977_v11 = vpop.f32.mrf.mxu0 }
 0x292   : > { %1041 = vst [vmem:[%s3773_s12 + $0x28] sm:$0xff] %v983_v10  ;;  %v978_v12 = vadd.f32 %v2736_v46, %v977_v11 }
 0x293   : > { %v3038_v22 = vpop.f32.mrf.mxu0 }
 0x294   : > { %1040 = vst [vmem:[%s3773_s12 + $0x20] sm:$0xff] %v978_v12  ;;  %v993_v24 = vadd.f32 %v3038_v22, %v2736_v46 }
 0x295   : > { %v987_v25 = vpop.f32.mrf.mxu0 }
 0x296   : > { %1043 = vst [vmem:[%s3773_s12 + $0x38] sm:$0xff] %v993_v24  ;;  %v988_v26 = vadd.f32 %v2736_v46, %v987_v25 }
 0x297   : > { %v3041_v27 = vpop.f32.mrf.mxu0 }
 0x298   : > { %1042 = vst [vmem:[%s3773_s12 + $0x30] sm:$0xff] %v988_v26  ;;  %v1003_v29 = vadd.f32 %v3041_v27, %v2736_v46 }
 0x299   : > { %v997_v30 = vpop.f32.mrf.mxu0 }
 0x29a   : > { %1045 = vst [vmem:[%s3773_s12 + $0x48] sm:$0xff] %v1003_v29  ;;  %v998_v31 = vadd.f32 %v2736_v46, %v997_v30 }
 0x29b   : > { %v3044_v32 = vpop.f32.mrf.mxu0 }
 0x29c   : > { %1044 = vst [vmem:[%s3773_s12 + $0x40] sm:$0xff] %v998_v31  ;;  %v1013_v34 = vadd.f32 %v3044_v32, %v2736_v46 }
 0x29d   : > { %v1007_v35 = vpop.f32.mrf.mxu0 }
 0x29e   : > { %1047 = vst [vmem:[%s3773_s12 + $0x58] sm:$0xff] %v1013_v34  ;;  %v1008_v36 = vadd.f32 %v2736_v46, %v1007_v35 }
 0x29f   : > { %v3047_v37 = vpop.f32.mrf.mxu0 }
 0x2a0   : > { %1046 = vst [vmem:[%s3773_s12 + $0x50] sm:$0xff] %v1008_v36  ;;  %v1023_v39 = vadd.f32 %v3047_v37, %v2736_v46 }
 0x2a1   : > { %v1017_v40 = vpop.f32.mrf.mxu0 }
 0x2a2   : > { %1049 = vst [vmem:[%s3773_s12 + $0x68] sm:$0xff] %v1023_v39  ;;  %v1018_v41 = vadd.f32 %v2736_v46, %v1017_v40 }
 0x2a3   : > { %v3050_v42 = vpop.f32.mrf.mxu0 }
 0x2a4   : > { %1048 = vst [vmem:[%s3773_s12 + $0x60] sm:$0xff] %v1018_v41  ;;  %v1033_v45 = vadd.f32 %v3050_v42, %v2736_v46 }
 0x2a5   : > { %v1027_v47 = vpop.f32.mrf.mxu0 }
 0x2a6   : > { %1051 = vst [vmem:[%s3773_s12 + $0x78] sm:$0xff] %v1033_v45  ;;  %v1028_v48 = vadd.f32 %v2736_v46, %v1027_v47 }
 0x2a7   : > { %v3093_v49 = vpop.f32.mrf.mxu0 }
 0x2a8   : > { %1050 = vst [vmem:[%s3773_s12 + $0x70] sm:$0xff] %v1028_v48  ;;  %s3306_s12 = sshll.u32 %s3366_s17, 4  ;;  %s3307_s12 = int_to_ptr.vmem [resolvable:$false] %s3306_s12 }
 0x2a9   : > { %v1271_v52 = vpop.f32.mrf.mxu0  ;;  %s3308_s20 = scalar_lea.vmem %s3307_s12, 4096  ;;  %p3309_p0 = scmp.lt.s32.totalorder %s3887_s21, %s3307_s12 }
 0x2aa   : > { %3116 = vmatpush3.xpose.msk.msra.mxu1 %vm402_vm0, %v1271_v52  ;;  %p3310_p1 = scmp.lt.s32.totalorder %s3308_s20, %s3302_s11 }
 0x2ab   : > { %v3096_v53 = vpop.f32.mrf.mxu0  ;;  %3120 = vmatprep.subr.mxu1 %v3364_v43 }
 0x2ac   : > { %p3311_p2 = por %p3310_p1, %p3309_p0 }
 0x2ad   : > { %v1281_v56 = vpop.f32.mrf.mxu0  ;;  %3118 = vmatmul.mubr.msk.f32.vlgmr.msra.gmra.mxu1 %vm402_vm0, %v1122_v9 }
 0x2ae   : > { %3121 = vmatpush3.xpose.msk.msra.mxu1 %vm402_vm0, %v3093_v49  ;;  %3122 = vmatprep.mubr.msk.f32.mxu1 %vm3365_vm1, %v3364_v43  ;;  %p3312_p3 = pnand %p3311_p2, %p3305_p13 }
 0x2af   : > { %v3099_v57 = vpop.f32.mrf.mxu0  ;;  %3125 = vmatprep.subr.mxu1 %v3364_v43 }
 0x2b1   : > { %v1291_v60 = vpop.f32.mrf.mxu0  ;;  %3123 = vmatmul.mubr.msk.f32.vlgmr.msra.gmra.mxu1 %vm402_vm0, %v3776_v3 }
 0x2b2   : > { %3126 = vmatpush3.xpose.msk.msra.mxu1 %vm402_vm0, %v1281_v56  ;;  %3127 = vmatprep.mubr.msk.f32.mxu1 %vm3365_vm1, %v3364_v43 }
 0x2b3   : > { %v3102_v62 = vpop.f32.mrf.mxu0  ;;  %3130 = vmatprep.subr.mxu1 %v3364_v43 }
 0x2b5   : > { %v1301_v1 = vpop.f32.mrf.mxu0  ;;  %3128 = vmatmul.mubr.msk.f32.vlgmr.msra.gmra.mxu1 %vm402_vm0, %v1132_v28 }
 0x2b6   : > { %3131 = vmatpush3.xpose.msk.msra.mxu1 %vm402_vm0, %v3096_v53  ;;  %3132 = vmatprep.mubr.msk.f32.mxu1 %vm3365_vm1, %v3364_v43 }
 0x2b7   : > { %v3105_v2 = vpop.f32.mrf.mxu0  ;;  %3135 = vmatprep.subr.mxu1 %v3364_v43 }
 0x2b9   : > { %v1311_v13 = vpop.f32.mrf.mxu0  ;;  %3133 = vmatmul.mubr.msk.f32.vlgmr.msra.gmra.mxu1 %vm402_vm0, %v3782_v23 }
 0x2ba   : > { %3136 = vmatpush3.xpose.msk.msra.mxu1 %vm402_vm0, %v1291_v60  ;;  %3156 = vmatpush3.xpose.msk.msra.mxu0 %vm402_vm0, %v1311_v13 }
 0x2bb   : > { %v3108_v14 = vpop.f32.mrf.mxu0  ;;  %3137 = vmatprep.mubr.msk.f32.mxu1 %vm3365_vm1, %v3364_v43  ;;  %3140 = vmatprep.subr.mxu1 %v3364_v43 }
 0x2bc   : > { %3165 = vmatprep.subr.mxu0 %v3364_v43 }
 0x2bd   : > { %v1321_v16 = vpop.f32.mrf.mxu0  ;;  %3138 = vmatmul.mubr.msk.f32.vlgmr.msra.gmra.mxu1 %vm402_vm0, %v1142_v38  ;;  %3158 = vmatmul.mubr.msk.f32.vlgmr.msra.gmra.mxu0 %vm402_vm0, %v1162_v59 }
 0x2be   : > { %3141 = vmatpush3.xpose.msk.msra.mxu1 %vm402_vm0, %v3099_v57  ;;  %3166 = vmatpush3.xpose.msk.msra.mxu0 %vm402_vm0, %v1321_v16 }
 0x2bf   : > { %v3111_v17 = vpop.f32.mrf.mxu0  ;;  %3142 = vmatprep.mubr.msk.f32.mxu1 %vm3365_vm1, %v3364_v43  ;;  %3167 = vmatprep.mubr.msk.f32.mxu0 %vm3365_vm1, %v3364_v43 }
 0x2c0   : > { %3145 = vmatprep.subr.mxu1 %v3364_v43  ;;  %3175 = vmatprep.subr.mxu0 %v3364_v43 }
 0x2c1   : > { %v1331_v18 = vpop.f32.mrf.mxu0  ;;  %3143 = vmatmul.mubr.msk.f32.vlgmr.msra.gmra.mxu1 %vm402_vm0, %v3788_v33  ;;  %3168 = vmatmul.mubr.msk.f32.vlgmr.msra.gmra.mxu0 %vm402_vm0, %v1172_v4 }
 0x2c2   : > { %3146 = vmatpush3.xpose.msk.msra.mxu1 %vm402_vm0, %v1301_v1  ;;  %3176 = vmatpush3.xpose.msk.msra.mxu0 %vm402_vm0, %v1331_v18 }
 0x2c3   : > { %v3114_v20 = vpop.f32.mrf.mxu0  ;;  %3147 = vmatprep.mubr.msk.f32.mxu1 %vm3365_vm1, %v3364_v43  ;;  %3177 = vmatprep.mubr.msk.f32.mxu0 %vm3365_vm1, %v3364_v43 }
 0x2c4   : > { %3150 = vmatprep.subr.mxu1 %v3364_v43  ;;  %3185 = vmatprep.subr.mxu0 %v3364_v43 }
 0x2c5   : > { %v1341_v46 = vpop.f32.mrf.mxu0  ;;  %3148 = vmatmul.mubr.msk.f32.vlgmr.msra.gmra.mxu1 %vm402_vm0, %v1152_v50  ;;  %3178 = vmatmul.mubr.msk.f32.vlgmr.msra.gmra.mxu0 %vm402_vm0, %v1182_v19 }
 0x2c6   : > { %3151 = vmatpush3.xpose.msk.msra.mxu1 %vm402_vm0, %v3102_v62  ;;  %3186 = vmatpush3.xpose.msk.msra.mxu0 %vm402_vm0, %v1341_v46 }
 0x2c7   : > { %3152 = vmatprep.mubr.msk.f32.mxu1 %vm3365_vm1, %v3364_v43  ;;  %3187 = vmatprep.mubr.msk.f32.mxu0 %vm3365_vm1, %v3364_v43 }
 0x2c8   : > { %3160 = vmatprep.subr.mxu1 %v3364_v43 }
 0x2c9   : > { %3153 = vmatmul.mubr.msk.f32.vlgmr.msra.gmra.mxu1 %vm402_vm0, %v3794_v44  ;;  %3188 = vmatmul.mubr.msk.f32.vlgmr.msra.gmra.mxu0 %vm402_vm0, %v1192_v51 }
 0x2ca   : > { %3161 = vmatpush3.xpose.msk.msra.mxu1 %vm402_vm0, %v3105_v2  ;;  %3162 = vmatprep.mubr.msk.f32.mxu1 %vm3365_vm1, %v3364_v43 }
 0x2cb   : > { %3170 = vmatprep.subr.mxu1 %v3364_v43 }
 0x2cd   : > { %3163 = vmatmul.mubr.msk.f32.vlgmr.msra.gmra.mxu1 %vm402_vm0, %v3801_v55 }
 0x2ce   : > { %3171 = vmatpush3.xpose.msk.msra.mxu1 %vm402_vm0, %v3108_v14  ;;  %3172 = vmatprep.mubr.msk.f32.mxu1 %vm3365_vm1, %v3364_v43 }
 0x2cf   : > { %3180 = vmatprep.subr.mxu1 %v3364_v43 }
 0x2d1   : > { %3173 = vmatmul.mubr.msk.f32.vlgmr.msra.gmra.mxu1 %vm402_vm0, %v3076_v63 }
 0x2d2   : > { %3181 = vmatpush3.xpose.msk.msra.mxu1 %vm402_vm0, %v3111_v17  ;;  %3182 = vmatprep.mubr.msk.f32.mxu1 %vm3365_vm1, %v3364_v43 }
 0x2d3   : > { %3190 = vmatprep.subr.mxu1 %v3364_v43 }
 0x2d5   : > { %3183 = vmatmul.mubr.msk.f32.vlgmr.msra.gmra.mxu1 %vm402_vm0, %v3079_v15 }
 0x2d6   : > { %3191 = vmatpush3.xpose.msk.msra.mxu1 %vm402_vm0, %v3114_v20  ;;  %3192 = vmatprep.mubr.msk.f32.mxu1 %vm3365_vm1, %v3364_v43 }
 0x2d9   : > { %3193 = vmatmul.mubr.msk.f32.vlgmr.msra.gmra.mxu1 %vm402_vm0, %v3082_v21 }
 0x2da   : > { %3315 = shalt.err (!%p3312_p3)
}
 0x2db   : > { %s3316_s27 = scalar_lea.hbm %s3885_s28, 2048  ;;  %s3320_s26 = scalar_lea.hbm %s3979_s9, 4096 }
 0x2dc   : > { %p3317_p4 = scmp.ne.s32.totalorder %s3885_s28, %s3316_s27  ;;  %p3321_p9 = scmp.lt.s32.totalorder %s3885_s28, %s3979_s9 }
 0x2dd   : > { %p3322_p10 = scmp.lt.s32.totalorder %s3320_s26, %s3316_s27 }
 0x2de   : > { %p3318_p7 = pnand %p3317_p4, %p3462_p5 }
 0x2df   : > { %p3323_p11 = por %p3322_p10, %p3321_p9 }
 0x2e0   : > { %p3319_p8 = pneg %p3318_p7 }
 0x2e2   : > { %p3324_p12 = pnand %p3323_p11, %p3319_p8 }
 0x2e4   : > { %3327 = shalt.err (!%p3324_p12)
}
 0x2e5   : > { %s3367_s20 = smov 128   ;;  %s3368_s11 = smov 8   ;;  %vm2566_vm2 = vcmask 64512  }
 0x2e6   : > { %3195 = dma.vmem_to_hbm [thread:$0]  (%p3462_p5), %s3887_s21, 2048, %s3885_s28, %s3891_s30, %s3367_s20, %s3367_s20, %s3368_s11  }
 0x2e7   : > { %s3988_s12 = sshll.u32 %s3994_s29, 3 }
 0x2e8   : > { %s3919_s1 = scalar_lea.vmem %s3980_s10, %s3988_s12 }
 0x36d   : > { %v1422_v43 = vpop.f32.mrf.mxu1 }
 0x36e   : > { %2567 = vst.msk [vmem:[%s3919_s1] sm:$0xff] %vm2566_vm2, %v1422_v43 }
 0x36f   : > { %v3119_v54 = vpop.f32.mrf.mxu1 }
 0x371   : > { %v1498_v58 = vpop.f32.mrf.mxu1 }
 0x372   : > { %2568 = vst.msk [vmem:[%s3919_s1 + $0x8] sm:$0xff] %vm2566_vm2, %v1498_v58 }
 0x373   : > { %v3124_v61 = vpop.f32.mrf.mxu1 }
 0x375   : > { %v1574_v0 = vpop.f32.mrf.mxu1 }
 0x376   : > { %2569 = vst.msk [vmem:[%s3919_s1 + $0x10] sm:$0xff] %vm2566_vm2, %v1574_v0 }
 0x377   : > { %v3129_v3 = vpop.f32.mrf.mxu1 }
 0x379   : > { %v1650_v5 = vpop.f32.mrf.mxu1 }
 0x37a   : > { %2570 = vst.msk [vmem:[%s3919_s1 + $0x18] sm:$0xff] %vm2566_vm2, %v1650_v5 }
 0x37b   : > { %v3134_v6 = vpop.f32.mrf.mxu1 }
 0x37d   : > { %v1726_v7 = vpop.f32.mrf.mxu1  ;;  %v2030_v8 = vpop.f32.mrf.mxu0 }
 0x37e   : > { %2571 = vst.msk [vmem:[%s3919_s1 + $0x20] sm:$0xff] %vm2566_vm2, %v1726_v7  ;;  %2575 = vst.msk [vmem:[%s3919_s1 + $0x40] sm:$0xff] %vm2566_vm2, %v2030_v8 }
 0x37f   : > { %v3139_v9 = vpop.f32.mrf.mxu1  ;;  %v3159_v10 = vpop.f32.mrf.mxu0 }
 0x381   : > { %v1802_v11 = vpop.f32.mrf.mxu1  ;;  %v2182_v12 = vpop.f32.mrf.mxu0 }
 0x382   : > { %2572 = vst.msk [vmem:[%s3919_s1 + $0x28] sm:$0xff] %vm2566_vm2, %v1802_v11  ;;  %2577 = vst.msk [vmem:[%s3919_s1 + $0x50] sm:$0xff] %vm2566_vm2, %v2182_v12 }
 0x383   : > { %v3144_v22 = vpop.f32.mrf.mxu1  ;;  %v3169_v23 = vpop.f32.mrf.mxu0 }
 0x385   : > { %v1878_v24 = vpop.f32.mrf.mxu1  ;;  %v2334_v25 = vpop.f32.mrf.mxu0 }
 0x386   : > { %2573 = vst.msk [vmem:[%s3919_s1 + $0x30] sm:$0xff] %vm2566_vm2, %v1878_v24  ;;  %2579 = vst.msk [vmem:[%s3919_s1 + $0x60] sm:$0xff] %vm2566_vm2, %v2334_v25 }
 0x387   : > { %v3149_v26 = vpop.f32.mrf.mxu1  ;;  %v3179_v27 = vpop.f32.mrf.mxu0 }
 0x389   : > { %v1954_v28 = vpop.f32.mrf.mxu1  ;;  %v2486_v29 = vpop.f32.mrf.mxu0 }
 0x38a   : > { %2574 = vst.msk [vmem:[%s3919_s1 + $0x38] sm:$0xff] %vm2566_vm2, %v1954_v28  ;;  %2581 = vst.msk [vmem:[%s3919_s1 + $0x70] sm:$0xff] %vm2566_vm2, %v2486_v29 }
 0x38b   : > { %v3154_v30 = vpop.f32.mrf.mxu1  ;;  %v3189_v31 = vpop.f32.mrf.mxu0 }
 0x38d   : > { %v2106_v32 = vpop.f32.mrf.mxu1 }
 0x38e   : > { %2576 = vst.msk [vmem:[%s3919_s1 + $0x48] sm:$0xff] %vm2566_vm2, %v2106_v32 }
 0x38f   : > { %v3164_v33 = vpop.f32.mrf.mxu1 }
 0x391   : > { %v2258_v34 = vpop.f32.mrf.mxu1 }
 0x392   : > { %2578 = vst.msk [vmem:[%s3919_s1 + $0x58] sm:$0xff] %vm2566_vm2, %v2258_v34 }
 0x393   : > { %v3174_v35 = vpop.f32.mrf.mxu1 }
 0x395   : > { %v2410_v36 = vpop.f32.mrf.mxu1 }
 0x396   : > { %2580 = vst.msk [vmem:[%s3919_s1 + $0x68] sm:$0xff] %vm2566_vm2, %v2410_v36 }
 0x397   : > { %v3184_v37 = vpop.f32.mrf.mxu1 }
 0x399   : > { %v2562_v38 = vpop.f32.mrf.mxu1 }
 0x39a   : > { %2582 = vst.msk [vmem:[%s3919_s1 + $0x78] sm:$0xff] %vm2566_vm2, %v2562_v38 }
 0x39b   : > { %v3194_v39 = vpop.f32.mrf.mxu1 }
 0x39c PF: > { %p3201_p5 = scmp.ge.s32.totalorder %s3362_s16, 2  ;;  %s2621_s0 = sand.u32 1, %s3350_s13  }
 0x39d   : > { %s2622_s23 = scalar_lea.sflag [#allocation3], %s2621_s0 }
 0x39e   : > { %p3198_p13 = pnand %p3201_p5, %p3466_p6 }
 0x3a0   : > { %p3199_p0 = pneg %p3198_p13 }
 0x3a2   : > { %3345 = dma.done.wait (%p3199_p0), %s2622_s23, 2048  }
 0x3a3   : > { %3347 = vsyncadd (%p3199_p0), %s2622_s23, 4294965248  ;;  %p21_p1 = scmp.ge.s32.totalorder %s3449_s19, 4   ;;  %s3989_s13 = smov %s3354_s14 }
 0x3a4   : > { %s3990_s14 = smov %s3358_s15  ;;  %s3991_s15 = smov %s3460_s22 }
 0x3a5   : > { %s3992_s16 = smov %s3449_s19  ;;  %23 = sbr.rel (!%p21_p1) target bundleno = 6 (0x6), region = 103 }
 0x3aa   :  { %2635 = vsyncpa [#allocation3], 1 }
 0x3ab   :  { %2637 = vsyncpa [#allocation3 + $0x1], 1 }

</bundles_post_ra>
